<compile_context>
chip_gen: v7x
topology: tpu7x:2x2x1
jax: 0.10.0
libtpu: 0.0.40
codegen_flags: <defaults>
</compile_context>

<pallas_src>
import jax
import jax.numpy as jnp
from jax.experimental import pallas as pl
from jax.experimental.pallas import tpu as pltpu

LANE = 128        # feature-axis padding (lane width)
SUBLANE = 16      # node-axis padding (bf16 sublane pack)
EPS = 1e-5
NEG_BIG = -1e30   # f32 sentinel for padded softmax lanes (never cast to bf16)


def _round_up(v, m):
    return (v + m - 1) // m * m


# -----------------------------------------------------------------------------
# Fused Pallas kernel (all layers; static config closed over at trace time)
# -----------------------------------------------------------------------------
def _make_fused_kernel(n_hidden, assoc_adj_first):
    """assoc_adj_first[l]: True  -> (adj @ h) @ W   (cheaper when Fin <= Fout)
                           False -> adj @ (h @ W)   (cheaper when Fout <  Fin)"""

    def kernel(*refs):
        adj_ref, x_ref = refs[0], refs[1]
        o_ref = refs[-1]
        p = refs[2:-1]

        adj = adj_ref[...]                       # bf16 (n_pad, n_pad)
        h = x_ref[...]                           # bf16 (n_pad, F0_pad)

        def agg_linear(h_bf, w_bf, adj_first):
            # bf16 MXU matmuls, f32 accumulation.
            if adj_first:
                t = jnp.dot(adj, h_bf, preferred_element_type=jnp.float32)
                return jnp.dot(t.astype(jnp.bfloat16), w_bf,
                               preferred_element_type=jnp.float32)
            t = jnp.dot(h_bf, w_bf, preferred_element_type=jnp.float32)
            return jnp.dot(adj, t.astype(jnp.bfloat16),
                           preferred_element_type=jnp.float32)

        idx = 0
        for li in range(n_hidden):
            w = p[idx][...]                      # bf16, BN scale pre-folded
            shift = p[idx + 1][...]              # f32 (1,Fpad): beta + (b-mean)*scale
            idx += 2
            lin = agg_linear(h, w, assoc_adj_first[li])
            # GCN bias + BatchNorm1d(eval) + ReLU, fused into one add + max
            h = jnp.maximum(lin + shift, 0.0).astype(jnp.bfloat16)
            # dropout: identity at inference
            # TODO(synk): training-mode dropout (pltpu.prng_*) not implemented.

        w = p[idx][...]                          # bf16
        b = p[idx + 1][...]                      # f32; padded lanes carry -1e30
        logits = agg_linear(h, w, assoc_adj_first[n_hidden]) + b

        # plain log_softmax in f32 — padded lanes already masked via the bias
        m = jnp.max(logits, axis=-1, keepdims=True)
        z = logits - m
        lse = jnp.log(jnp.sum(jnp.exp(z), axis=-1, keepdims=True))
        o_ref[...] = z - lse

    return kernel


# -----------------------------------------------------------------------------
# One-time prepare: padding, BN/bias folding, bf16 casts (hoisted out of forward)
# -----------------------------------------------------------------------------
def prepare_gcn(x, adj, params):
    layers = params["layers"]          # list of (W [Fin,Fout], b [1,Fout])
    bns = params["bns"]                # list of dicts gamma/beta/mean/var [1,F]
    n_hidden = len(layers) - 1

    n = x.shape[0]
    n_pad = _round_up(max(n, SUBLANE), SUBLANE)
    dims = [x.shape[1]] + [w.shape[1] for w, _ in layers]
    dims_pad = [_round_up(d, LANE) for d in dims]

    adj_p = (jnp.zeros((n_pad, n_pad), jnp.float32)
             .at[:n, :n].set(adj).astype(jnp.bfloat16))
    x_p = (jnp.zeros((n_pad, dims_pad[0]), jnp.float32)
           .at[:n, :dims[0]].set(x).astype(jnp.bfloat16))

    flat = [adj_p, x_p]
    assoc = []
    for li in range(n_hidden):
        w, b = layers[li]
        bn = bns[li]
        fin, fout = dims[li], dims[li + 1]
        fin_p, fout_p = dims_pad[li], dims_pad[li + 1]
        scale = bn["gamma"] * jax.lax.rsqrt(bn["var"] + EPS)      # (1, fout)
        shift = bn["beta"] + (b - bn["mean"]) * scale             # bias AFTER agg, folded
        w_eff = w * scale                                         # fold BN scale into W cols
        w_p = (jnp.zeros((fin_p, fout_p), jnp.float32)
               .at[:fin, :fout].set(w_eff).astype(jnp.bfloat16))
        shift_p = jnp.zeros((1, fout_p), jnp.float32).at[:, :fout].set(shift)
        flat += [w_p, shift_p]
        assoc.append(fin <= fout)

    w, b = layers[-1]
    fin, fout = dims[-2], dims[-1]
    fin_p, fout_p = dims_pad[-2], dims_pad[-1]
    w_p = (jnp.zeros((fin_p, fout_p), jnp.float32)
           .at[:fin, :fout].set(w).astype(jnp.bfloat16))
    # softmax mask moved into data: invalid lanes get -1e30 (kept in f32)
    b_p = jnp.full((1, fout_p), NEG_BIG, jnp.float32).at[:, :fout].set(b)
    flat += [w_p, b_p]
    assoc.append(fin <= fout)

    meta = dict(n=n, n_pad=n_pad, out_dim=fout, n_hidden=n_hidden,
                assoc=tuple(assoc), dims=tuple(dims), dims_pad=tuple(dims_pad))
    return tuple(flat), meta


# -----------------------------------------------------------------------------
# Build the jitted forward: one pallas_call + final slice
# -----------------------------------------------------------------------------
def build_gcn_forward(meta):
    n, n_pad = meta["n"], meta["n_pad"]
    out_dim = meta["out_dim"]
    dims_pad = meta["dims_pad"]
    n_hidden = meta["n_hidden"]
    assoc = meta["assoc"]

    # advisory cost estimate
    flops = 0
    for li in range(n_hidden + 1):
        fin_p, fout_p = dims_pad[li], dims_pad[li + 1]
        if assoc[li]:
            flops += 2 * n_pad * n_pad * fin_p + 2 * n_pad * fin_p * fout_p
        else:
            flops += 2 * n_pad * fin_p * fout_p + 2 * n_pad * n_pad * fout_p
    transcendentals = n_pad * dims_pad[-1] + n_pad            # exp + log
    in_bytes = n_pad * n_pad * 2 + n_pad * dims_pad[0] * 2    # adj, x (bf16)
    for li in range(n_hidden + 1):
        in_bytes += dims_pad[li] * dims_pad[li + 1] * 2 + dims_pad[li + 1] * 4
    out_bytes = n_pad * dims_pad[-1] * 4
    cost = pl.CostEstimate(flops=flops, transcendentals=transcendentals,
                           bytes_accessed=in_bytes + out_bytes)

    # explicit VMEM budget: inputs + output + a few live h/accumulator panels
    interm = 3 * n_pad * max(dims_pad) * 4
    vmem_limit = int(min(128 << 20,
                         max(32 << 20, 2 * (in_bytes + out_bytes + interm))))

    kernel = _make_fused_kernel(n_hidden, assoc)
    vmem = pl.BlockSpec(memory_space=pltpu.MemorySpace.VMEM)
    n_inputs = 2 + 2 * (n_hidden + 1)

    call = pl.pallas_call(
        kernel,
        out_shape=jax.ShapeDtypeStruct((n_pad, dims_pad[-1]), jnp.float32),
        in_specs=[vmem] * n_inputs,
        out_specs=vmem,
        compiler_params=pltpu.CompilerParams(vmem_limit_bytes=vmem_limit),
        cost_estimate=cost,
    )

    @jax.jit
    def forward(*flat):
        out_pad = call(*flat)
        return out_pad[:n, :out_dim]

    return forward


# -----------------------------------------------------------------------------
# Pure-JAX f32 reference (eval-mode forward of the module)
# -----------------------------------------------------------------------------
def gcn_reference(x, adj, params):
    layers = params["layers"]
    bns = params["bns"]
    h = x
    for i in range(len(layers) - 1):
        w, b = layers[i]
        bn = bns[i]
        h = adj @ (h @ w) + b                                   # bias AFTER aggregation
        h = (h - bn["mean"]) * jax.lax.rsqrt(bn["var"] + EPS) * bn["gamma"] + bn["beta"]
        h = jnp.maximum(h, 0.0)
    w, b = layers[-1]
    logits = adj @ (h @ w) + b
    return jax.nn.log_softmax(logits, axis=-1)


# -----------------------------------------------------------------------------
# Deterministic parameter / input construction
# -----------------------------------------------------------------------------
def init_gcn_params(key, in_dim, hid_dim, out_dim, n_layers):
    dims = [in_dim] + [hid_dim] * (n_layers - 1) + [out_dim]
    layers, bns = [], []
    for li in range(n_layers):
        key, kw = jax.random.split(key)
        fan_in, fan_out = dims[li], dims[li + 1]
        scale = 1.0 / jnp.sqrt(jnp.float32(fan_in))
        w = jax.random.uniform(kw, (fan_in, fan_out), jnp.float32, -scale, scale)
        b = 0.05 * jnp.ones((1, fan_out), jnp.float32)
        layers.append((w, b))
        if li < n_layers - 1:
            key, kg, kb, km, kv = jax.random.split(key, 5)
            bns.append({
                "gamma": jax.random.uniform(kg, (1, fan_out), jnp.float32, 0.5, 1.5),
                "beta":  0.1 * jax.random.normal(kb, (1, fan_out), jnp.float32),
                "mean":  0.1 * jax.random.normal(km, (1, fan_out), jnp.float32),
                "var":   jax.random.uniform(kv, (1, fan_out), jnp.float32, 0.5, 1.5),
            })
    return {"layers": layers, "bns": bns}


def make_normalized_adjacency(key, n_nodes, p_edge=0.15):
    """Dense symmetric random graph, self-loops, D^-1/2 (A+I) D^-1/2."""
    a = (jax.random.uniform(key, (n_nodes, n_nodes)) < p_edge).astype(jnp.float32)
    a = jnp.maximum(a, a.T)
    a = jnp.minimum(a + jnp.eye(n_nodes, dtype=jnp.float32), 1.0)
    deg = jnp.sum(a, axis=1)
    d_inv_sqrt = 1.0 / jnp.sqrt(deg)
    return a * d_inv_sqrt[:, None] * d_inv_sqrt[None, :]


if __name__ == "__main__":
    N_NODES, IN_DIM, HID_DIM, OUT_DIM, N_LAYERS = 32, 16, 32, 8, 3
    DROPOUT = 0.5  # identity at inference (model.eval())

    key = jax.random.PRNGKey(0)
    k_x, k_adj, k_p = jax.random.split(key, 3)

    x = jax.random.normal(k_x, (N_NODES, IN_DIM), jnp.float32)
    adj = make_normalized_adjacency(k_adj, N_NODES)
    params = init_gcn_params(k_p, IN_DIM, HID_DIM, OUT_DIM, N_LAYERS)

    # one-time prepare (padding, BN/bias folding, bf16 casts) — not per call
    flat, meta = prepare_gcn(x, adj, params)
    gcn_forward = build_gcn_forward(meta)

    out = jax.block_until_ready(gcn_forward(*flat))

    assert out.shape == (N_NODES, OUT_DIM)
    # log_softmax rows exponentiate-sum to 1 (epilogue is f32)
    assert jnp.allclose(jnp.sum(jnp.exp(out), axis=-1), 1.0, atol=1e-4)
    # match the pure-f32 reference (tolerance loosened for bf16 matmul inputs)
    ref = gcn_reference(x, adj, params)
    max_err = float(jnp.max(jnp.abs(out - ref)))
    assert jnp.allclose(out, ref, atol=5e-2, rtol=5e-2), f"max |err| = {max_err}"
    print("KERNEL_OK")
</pallas_src>

<mosaic_0001>
module attributes {stable_mosaic.version = 11 : i64} {
  func.func @kernel(%arg0: memref<32x32xbf16, #tpu.memory_space<vmem>>, %arg1: memref<32x128xbf16, #tpu.memory_space<vmem>>, %arg2: memref<128x128xbf16, #tpu.memory_space<vmem>>, %arg3: memref<1x128xf32, #tpu.memory_space<vmem>>, %arg4: memref<128x128xbf16, #tpu.memory_space<vmem>>, %arg5: memref<1x128xf32, #tpu.memory_space<vmem>>, %arg6: memref<128x128xbf16, #tpu.memory_space<vmem>>, %arg7: memref<1x128xf32, #tpu.memory_space<vmem>>, %arg8: memref<32x128xf32, #tpu.memory_space<vmem>>) attributes {dimension_semantics = [], scalar_prefetch = 0 : i64, scratch_operands = 0 : i64, tpu.core_type = #tpu.core_type<tc>} {
    %c0 = arith.constant 0 : index
    %c0_0 = arith.constant 0 : index
    %0 = vector.load %arg0[%c0, %c0_0] : memref<32x32xbf16, #tpu.memory_space<vmem>>, vector<32x32xbf16>
    %c0_1 = arith.constant 0 : index
    %c0_2 = arith.constant 0 : index
    %1 = vector.load %arg1[%c0_1, %c0_2] : memref<32x128xbf16, #tpu.memory_space<vmem>>, vector<32x128xbf16>
    %c0_3 = arith.constant 0 : index
    %c0_4 = arith.constant 0 : index
    %2 = vector.load %arg2[%c0_3, %c0_4] : memref<128x128xbf16, #tpu.memory_space<vmem>>, vector<128x128xbf16>
    %c0_5 = arith.constant 0 : index
    %c0_6 = arith.constant 0 : index
    %3 = vector.load %arg3[%c0_5, %c0_6] : memref<1x128xf32, #tpu.memory_space<vmem>>, vector<1x128xf32>
    %cst = arith.constant dense<0.000000e+00> : vector<32x128xf32>
    %4 = tpu.matmul %0, %1, %cst {dimension_numbers = #tpu.dot_dimension_numbers<[1], [0], [0], [1], [0, 0, 1, 1], [], []>} : vector<32x32xbf16>, vector<32x128xbf16>, vector<32x128xf32> -> vector<32x128xf32>
    %5 = arith.truncf %4 : vector<32x128xf32> to vector<32x128xbf16>
    %cst_7 = arith.constant dense<0.000000e+00> : vector<32x128xf32>
    %6 = tpu.matmul %5, %2, %cst_7 {dimension_numbers = #tpu.dot_dimension_numbers<[1], [0], [0], [1], [0, 0, 1, 1], [], []>} : vector<32x128xbf16>, vector<128x128xbf16>, vector<32x128xf32> -> vector<32x128xf32>
    %7 = vector.broadcast %3 : vector<1x128xf32> to vector<32x128xf32>
    %8 = arith.addf %6, %7 : vector<32x128xf32>
    %cst_8 = arith.constant 0.000000e+00 : f32
    %9 = vector.broadcast %cst_8 : f32 to vector<32x128xf32>
    %10 = arith.maximumf %8, %9 : vector<32x128xf32>
    %11 = arith.truncf %10 : vector<32x128xf32> to vector<32x128xbf16>
    %c0_9 = arith.constant 0 : index
    %c0_10 = arith.constant 0 : index
    %12 = vector.load %arg4[%c0_9, %c0_10] : memref<128x128xbf16, #tpu.memory_space<vmem>>, vector<128x128xbf16>
    %c0_11 = arith.constant 0 : index
    %c0_12 = arith.constant 0 : index
    %13 = vector.load %arg5[%c0_11, %c0_12] : memref<1x128xf32, #tpu.memory_space<vmem>>, vector<1x128xf32>
    %cst_13 = arith.constant dense<0.000000e+00> : vector<32x128xf32>
    %14 = tpu.matmul %0, %11, %cst_13 {dimension_numbers = #tpu.dot_dimension_numbers<[1], [0], [0], [1], [0, 0, 1, 1], [], []>} : vector<32x32xbf16>, vector<32x128xbf16>, vector<32x128xf32> -> vector<32x128xf32>
    %15 = arith.truncf %14 : vector<32x128xf32> to vector<32x128xbf16>
    %cst_14 = arith.constant dense<0.000000e+00> : vector<32x128xf32>
    %16 = tpu.matmul %15, %12, %cst_14 {dimension_numbers = #tpu.dot_dimension_numbers<[1], [0], [0], [1], [0, 0, 1, 1], [], []>} : vector<32x128xbf16>, vector<128x128xbf16>, vector<32x128xf32> -> vector<32x128xf32>
    %17 = vector.broadcast %13 : vector<1x128xf32> to vector<32x128xf32>
    %18 = arith.addf %16, %17 : vector<32x128xf32>
    %cst_15 = arith.constant 0.000000e+00 : f32
    %19 = vector.broadcast %cst_15 : f32 to vector<32x128xf32>
    %20 = arith.maximumf %18, %19 : vector<32x128xf32>
    %21 = arith.truncf %20 : vector<32x128xf32> to vector<32x128xbf16>
    %c0_16 = arith.constant 0 : index
    %c0_17 = arith.constant 0 : index
    %22 = vector.load %arg6[%c0_16, %c0_17] : memref<128x128xbf16, #tpu.memory_space<vmem>>, vector<128x128xbf16>
    %c0_18 = arith.constant 0 : index
    %c0_19 = arith.constant 0 : index
    %23 = vector.load %arg7[%c0_18, %c0_19] : memref<1x128xf32, #tpu.memory_space<vmem>>, vector<1x128xf32>
    %cst_20 = arith.constant dense<0.000000e+00> : vector<32x128xf32>
    %24 = tpu.matmul %21, %22, %cst_20 {dimension_numbers = #tpu.dot_dimension_numbers<[1], [0], [0], [1], [0, 0, 1, 1], [], []>} : vector<32x128xbf16>, vector<128x128xbf16>, vector<32x128xf32> -> vector<32x128xf32>
    %25 = arith.truncf %24 : vector<32x128xf32> to vector<32x128xbf16>
    %cst_21 = arith.constant dense<0.000000e+00> : vector<32x128xf32>
    %26 = tpu.matmul %0, %25, %cst_21 {dimension_numbers = #tpu.dot_dimension_numbers<[1], [0], [0], [1], [0, 0, 1, 1], [], []>} : vector<32x32xbf16>, vector<32x128xbf16>, vector<32x128xf32> -> vector<32x128xf32>
    %27 = vector.broadcast %23 : vector<1x128xf32> to vector<32x128xf32>
    %28 = arith.addf %26, %27 : vector<32x128xf32>
    %cst_22 = arith.constant dense<0xFF800000> : vector<32xf32>
    %29 = vector.multi_reduction <maximumf>, %28, %cst_22 [1] : vector<32x128xf32> to vector<32xf32>
    %30 = vector.shape_cast %29 : vector<32xf32> to vector<32x1xf32>
    %31 = vector.broadcast %30 : vector<32x1xf32> to vector<32x128xf32>
    %32 = arith.subf %28, %31 : vector<32x128xf32>
    %33 = math.exp %32 : vector<32x128xf32>
    %cst_23 = arith.constant dense<0.000000e+00> : vector<32xf32>
    %34 = vector.multi_reduction <add>, %33, %cst_23 [1] : vector<32x128xf32> to vector<32xf32>
    %35 = vector.shape_cast %34 : vector<32xf32> to vector<32x1xf32>
    %36 = math.log %35 : vector<32x1xf32>
    %37 = vector.broadcast %36 : vector<32x1xf32> to vector<32x128xf32>
    %38 = arith.subf %32, %37 : vector<32x128xf32>
    %c0_24 = arith.constant 0 : index
    %c0_25 = arith.constant 0 : index
    %39 = vector.load %arg8[%c0_24, %c0_25] : memref<32x128xf32, #tpu.memory_space<vmem>>, vector<32x128xf32>
    tpu.vector_store %arg8[%c0_24, %c0_25], %38 {strides = array<i32>} : memref<32x128xf32, #tpu.memory_space<vmem>>, vector<32x128xf32>,
    return
  }
}

</mosaic_0001>

<bundles_post_ra>
// kernel: forward.1
= control target key start
LH: loop header
LB: loop body
LE: loop exit
PB: predicated region body
PF: predicated region fallthrough
CT: control target
= control target key end

     0   :  { %13 = vsyncpa [#allocation3], 0  ;;  %s1219_s0 = inlined_call_operand.hbm [shape: bf16[32,32], index: 0, kind: input, shape index: {}]   ;;  %s1220_s1 = inlined_call_operand.hbm [shape: bf16[32,128], index: 1, kind: input, shape index: {}]   ;;  %s1221_s2 = inlined_call_operand.hbm [shape: bf16[128,128], index: 2, kind: input, shape index: {}]   ;;  %s1222_s3 = inlined_call_operand.vmem [shape: f32[1,128], index: 3, kind: input, shape index: {}]   ;;  %s1223_s4 = inlined_call_operand.hbm [shape: bf16[128,128], index: 4, kind: input, shape index: {}]   ;;  %s1224_s5 = inlined_call_operand.vmem [shape: f32[1,128], index: 5, kind: input, shape index: {}]   ;;  %s1225_s6 = inlined_call_operand.hbm [shape: bf16[128,128], index: 6, kind: input, shape index: {}]   ;;  %s1226_s7 = inlined_call_operand.vmem [shape: f32[1,128], index: 7, kind: input, shape index: {}]   ;;  %s1227_s8 = inlined_call_operand.vmem [shape: f32[32,128], index: 8, kind: output, shape index: {}]  }
   0x1   :  { %14 = vsyncpa [#allocation5], 0 }
   0x2   :  { %15 = vsyncpa [#allocation8], 0  ;;  %s1041_s27 = smov [#allocation4]   ;;  %s1042_s29 = smov [#allocation7]  }
   0x3   :  { %s33_s28 = sshll.u32 %s1041_s27, 4  ;;  %s59_s30 = sshll.u32 %s1042_s29, 4  ;;  %s34_s28 = int_to_ptr.vmem [resolvable:$true] %s33_s28  ;;  %s1093_s30 = int_to_ptr.vmem [resolvable:$true] %s59_s30 }
   0x4   :  { %s925_s11 = scalar_lea.hbm %s1220_s1, 256 }
   0x5   :  { %p926_p0 = scmp.ne.s32.totalorder %s1220_s1, %s925_s11  ;;  %p929_p1 = scmp.lt.u32.totalorder %s925_s11, %s1220_s1 }
   0x7   :  { %p931_p2 = pnand %p929_p1, %p926_p0 }
   0x9   :  { %934 = shalt.err (!%p931_p2)
}
   0xa   :  { %s935_s16 = scalar_lea.vmem %s34_s28, 256  ;;  %p940_p4 = scmp.lt.s32.totalorder %s34_s28, %s34_s28 }
   0xb   :  { %p936_p3 = scmp.ne.s32.totalorder %s34_s28, %s935_s16  ;;  %p941_p5 = scmp.lt.s32.totalorder %s935_s16, %s935_s16 }
   0xd   :  { %p942_p6 = por %p941_p5, %p940_p4 }
   0xf   :  { %p943_p7 = pnand %p942_p6, %p936_p3 }
  0x11   :  { %946 = shalt.err (!%p943_p7)
}
  0x12   :  { %s1043_s17 = smov 64   ;;  %s1044_s18 = smov 4  }
  0x13   :  { %39 = dma.hbm_to_vmem [thread:$0]  %s1220_s1, 256, %s34_s28, [#allocation5], %s1043_s17, %s1043_s17, %s1044_s18  }
  0x14   :  { %s947_s23 = scalar_lea.hbm %s1223_s4, 1024 }
  0x15   :  { %p948_p8 = scmp.ne.s32.totalorder %s1223_s4, %s947_s23  ;;  %p951_p9 = scmp.lt.u32.totalorder %s947_s23, %s1223_s4 }
  0x17   :  { %p953_p10 = pnand %p951_p9, %p948_p8 }
  0x19   :  { %956 = shalt.err (!%p953_p10)
}
  0x1a   :  { %s957_s29 = scalar_lea.vmem %s1093_s30, 1024  ;;  %p962_p12 = scmp.lt.s32.totalorder %s1093_s30, %s1093_s30 }
  0x1b   :  { %p958_p11 = scmp.ne.s32.totalorder %s1093_s30, %s957_s29  ;;  %p963_p13 = scmp.lt.s32.totalorder %s957_s29, %s957_s29 }
  0x1d   :  { %p964_p0 = por %p963_p13, %p962_p12 }
  0x1f   :  { %p965_p1 = pnand %p964_p0, %p958_p11 }
  0x21   :  { %968 = shalt.err (!%p965_p1)
}
  0x22   :  { %65 = dma.hbm_to_vmem [thread:$0]  %s1223_s4, 1024, %s1093_s30, [#allocation8], %s1043_s17, %s1043_s17, %s1044_s18  }
  0x23   :  { %s1045_s9 = smov [#allocation2]   ;;  %s1046_s11 = smov [#allocation6]  }
  0x24   :  { %s21_s10 = sshll.u32 %s1045_s9, 4  ;;  %s45_s12 = sshll.u32 %s1046_s11, 4  ;;  %s22_s10 = int_to_ptr.vmem [resolvable:$true] %s21_s10  ;;  %s1130_s12 = int_to_ptr.vmem [resolvable:$true] %s45_s12 }
  0x25   :  { %s969_s15 = scalar_lea.hbm %s1219_s0, 256 }
  0x26   :  { %p970_p2 = scmp.ne.s32.totalorder %s1219_s0, %s969_s15  ;;  %p973_p3 = scmp.lt.u32.totalorder %s969_s15, %s1219_s0 }
  0x28   :  { %p975_p4 = pnand %p973_p3, %p970_p2 }
  0x2a   :  { %978 = shalt.err (!%p975_p4)
}
  0x2b   :  { %s979_s4 = scalar_lea.vmem %s22_s10, 256  ;;  %p984_p6 = scmp.lt.s32.totalorder %s22_s10, %s22_s10 }
  0x2c   :  { %p980_p5 = scmp.ne.s32.totalorder %s22_s10, %s979_s4  ;;  %p985_p7 = scmp.lt.s32.totalorder %s979_s4, %s979_s4 }
  0x2e   :  { %p986_p8 = por %p985_p7, %p984_p6 }
  0x30   :  { %p987_p9 = pnand %p986_p8, %p980_p5 }
  0x32   :  { %990 = shalt.err (!%p987_p9)
}
  0x33   :  { %27 = dma.hbm_to_vmem [thread:$0]  %s1219_s0, 256, %s22_s10, [#allocation3], %s1043_s17, %s1043_s17, %s1044_s18  }
  0x34   :  { %s991_s25 = scalar_lea.hbm %s1221_s2, 1024 }
  0x35   :  { %p992_p10 = scmp.ne.s32.totalorder %s1221_s2, %s991_s25  ;;  %p995_p11 = scmp.lt.u32.totalorder %s991_s25, %s1221_s2 }
  0x37   :  { %p997_p12 = pnand %p995_p11, %p992_p10 }
  0x39   :  { %1000 = shalt.err (!%p997_p12)
}
  0x3a   :  { %s1001_s28 = scalar_lea.vmem %s1130_s12, 1024  ;;  %p1006_p0 = scmp.lt.s32.totalorder %s1130_s12, %s1130_s12 }
  0x3b   :  { %p1002_p13 = scmp.ne.s32.totalorder %s1130_s12, %s1001_s28  ;;  %p1007_p1 = scmp.lt.s32.totalorder %s1001_s28, %s1001_s28 }
  0x3d   :  { %p1008_p2 = por %p1007_p1, %p1006_p0 }
  0x3f   :  { %p1009_p3 = pnand %p1008_p2, %p1002_p13 }
  0x41   :  { %1012 = shalt.err (!%p1009_p3)
}
  0x42   :  { %51 = dma.hbm_to_vmem [thread:$0]  %s1221_s2, 1024, %s1130_s12, [#allocation5], %s1043_s17, %s1043_s17, %s1044_s18  }
  0x43   :  { %s1047_s10 = smov [#allocation9]   ;;  %s1013_s15 = scalar_lea.hbm %s1225_s6, 1024 }
  0x44   :  { %s73_s11 = sshll.u32 %s1047_s10, 4  ;;  %p1014_p4 = scmp.ne.s32.totalorder %s1225_s6, %s1013_s15  ;;  %s74_s11 = int_to_ptr.vmem [resolvable:$true] %s73_s11 }
  0x45   :  { %p1017_p5 = scmp.lt.u32.totalorder %s1013_s15, %s1225_s6 }
  0x47   :  { %p1019_p6 = pnand %p1017_p5, %p1014_p4 }
  0x49   :  { %1022 = shalt.err (!%p1019_p6)
}
  0x4a   :  { %s1023_s4 = scalar_lea.vmem %s74_s11, 1024  ;;  %p1028_p8 = scmp.lt.s32.totalorder %s74_s11, %s74_s11 }
  0x4b   :  { %p1024_p7 = scmp.ne.s32.totalorder %s74_s11, %s1023_s4  ;;  %p1029_p9 = scmp.lt.s32.totalorder %s1023_s4, %s1023_s4 }
  0x4d   :  { %p1030_p10 = por %p1029_p9, %p1028_p8 }
  0x4f   :  { %p1031_p11 = pnand %p1030_p10, %p1024_p7 }
  0x51   :  { %1034 = shalt.err (!%p1031_p11)
}
  0x52   :  { %79 = dma.hbm_to_vmem [thread:$0]  %s1225_s6, 1024, %s74_s11, [#allocation8], %s1043_s17, %s1043_s17, %s1044_s18  }
  0x53   :  { %1035 = dma.done.wait [#allocation3], 256  }
  0x54   :  { %1036 = vsyncadd [#allocation3], 4294967040 }
  0x55   :  { %1037 = dma.done.wait [#allocation5], 1280  }
  0x56   :  { %1038 = vsyncadd [#allocation5], 4294966016 }
  0x57   :  { %1039 = dma.done.wait [#allocation8], 2048  }
  0x58   :  { %1040 = vsyncadd [#allocation8], 4294965248  ;;  %v881_v0 = vld [vmem:[#allocation4] sm:$0xff]   ;;  %v882_v1 = vld [vmem:[#allocation4 + $0x8] sm:$0xff]   ;;  %vm145_vm0 = vcmask 261120  }
  0x59   :  { %790 = vmatprep.subr.bf16.mxu0 %v881_v0  ;;  %v1182_v2 = vld [vmem:[#allocation2] sm:$0xff]   ;;  %v886_v4 = vld [vmem:[#allocation6 + $0x8] sm:$0xff]   ;;  %v887_v6 = vld [vmem:[#allocation6 + $0x10] sm:$0xff]  }
  0x5a   :  { %791 = vmatpush3.bf16.msra.mxu0 %v881_v0  ;;  %794 = vmatprep.mubr.msk.bf16.mxu0 %vm145_vm0, %v1182_v2  ;;  %v885_v3 = vld [vmem:[#allocation6] sm:$0xff]   ;;  %v1186_v5 = vld [vmem:[#allocation2 + $0x8] sm:$0xff]   ;;  %v888_v7 = vld [vmem:[#allocation6 + $0x18] sm:$0xff]  }
  0x5b   :  { %792 = vmatprep.subr.bf16.mxu0 %v882_v1  ;;  %798 = vmatprep.subr.bf16.mxu1 %v885_v3  ;;  %v889_v8 = vld [vmem:[#allocation6 + $0x20] sm:$0xff]   ;;  %v890_v9 = vld [vmem:[#allocation6 + $0x28] sm:$0xff]   ;;  %v891_v10 = vld [vmem:[#allocation6 + $0x30] sm:$0xff]  }
  0x5c   :  { %799 = vmatpush3.bf16.msra.mxu1 %v885_v3  ;;  %v892_v11 = vld [vmem:[#allocation6 + $0x38] sm:$0xff]   ;;  %v717_v18 = vld [vmem:[%s1222_s3] ss:$0 sm:$0xff]  ;;  %v894_v34 = vld [vmem:[#allocation7 + $0x8] sm:$0xff]  }
  0x5d   :  { %800 = vmatprep.subr.bf16.mxu1 %v886_v4  ;;  %v893_v33 = vld [vmem:[#allocation7] sm:$0xff]   ;;  %v895_v35 = vld [vmem:[#allocation7 + $0x10] sm:$0xff]   ;;  %v896_v36 = vld [vmem:[#allocation7 + $0x18] sm:$0xff]  }
  0x5e   :  { %793 = vmatpush3.bf16.msra.mxu0 %v882_v1  ;;  %v897_v37 = vld [vmem:[#allocation7 + $0x20] sm:$0xff]   ;;  %v898_v38 = vld [vmem:[#allocation7 + $0x28] sm:$0xff]   ;;  %v899_v39 = vld [vmem:[#allocation7 + $0x30] sm:$0xff]  }
  0x5f   :  { %v900_v40 = vld [vmem:[#allocation7 + $0x38] sm:$0xff]   ;;  %v901_v41 = vld [vmem:[#allocation9] sm:$0xff]   ;;  %v902_v42 = vld [vmem:[#allocation9 + $0x8] sm:$0xff]  }
  0x60   :  { %801 = vmatpush3.bf16.msra.mxu1 %v886_v4  ;;  %v903_v43 = vld [vmem:[#allocation9 + $0x10] sm:$0xff]   ;;  %v904_v44 = vld [vmem:[#allocation9 + $0x18] sm:$0xff]   ;;  %v905_v45 = vld [vmem:[#allocation9 + $0x20] sm:$0xff]  }
  0x61   :  { %795 = vmatmul.mubr.msk.bf16.vlgmr.msra.gmra.mrb[0].mxu0 %vm145_vm0, %v1186_v5  ;;  %802 = vmatprep.subr.bf16.mxu1 %v887_v6  ;;  %v906_v46 = vld [vmem:[#allocation9 + $0x28] sm:$0xff]   ;;  %v907_v53 = vld [vmem:[#allocation9 + $0x30] sm:$0xff]   ;;  %v908_v54 = vld [vmem:[#allocation9 + $0x38] sm:$0xff]  }
  0x62   :  { %822 = vmatprep.mubr.msk.bf16.mxu0 %vm145_vm0, %v1182_v2  ;;  %v728_v55 = vld [vmem:[%s1224_s5] ss:$0 sm:$0xff] }
  0x64   :  { %803 = vmatpush3.bf16.msra.mxu1 %v887_v6 }
  0x65   :  { %804 = vmatprep.subr.bf16.mxu1 %v888_v7 }
  0x68   :  { %805 = vmatpush3.bf16.msra.mxu1 %v888_v7 }
  0x69   :  { %806 = vmatprep.subr.bf16.mxu1 %v889_v8 }
  0x6c   :  { %807 = vmatpush3.bf16.msra.mxu1 %v889_v8 }
  0x6d   :  { %808 = vmatprep.subr.bf16.mxu1 %v890_v9 }
  0x70   :  { %809 = vmatpush3.bf16.msra.mxu1 %v890_v9 }
  0x71   :  { %810 = vmatprep.subr.bf16.mxu1 %v891_v10 }
  0x74   :  { %811 = vmatpush3.bf16.msra.mxu1 %v891_v10 }
  0x75   :  { %812 = vmatprep.subr.bf16.mxu1 %v892_v11 }
  0x78   :  { %813 = vmatpush3.bf16.msra.mxu1 %v892_v11 }
  0x79   :  { %846 = vmatprep.subr.bf16.mxu1 %v901_v41 }
 0x134   :  { %v796_v12 = vpop.f32.mrb[0].mxu0 }
 0x135   :  { %v186_v13 = vpop.f32.mrb[1].mxu0 }
 0x136   :  { %v797_v14 = vpop.f32.mrb[2].mxu0 }
 0x137   :  { %v202_v15 = vpack.c.bf16 %v797_v14, %v796_v12  ;;  %v189_v16 = vpop.f32.mrb[3].mxu0 }
 0x138   :  { %v201_v17 = vpack.c.bf16 %v189_v16, %v186_v13  ;;  %v745_v13 = vld [vmem:[%s1226_s7] ss:$0 sm:$0xff] }
 0x13a   :  { %814 = vmatprep.mubr.bf16.mxu1 %v201_v17 }
 0x13b   :  { %815 = vmatmul.mubr.bf16.vlgmr.msra.gmra.mrb[0].mxu1 %v202_v15 }
 0x13c   :  { %847 = vmatpush3.bf16.msra.mxu1 %v901_v41 }
 0x13d   :  { %848 = vmatprep.subr.bf16.mxu1 %v902_v42 }
 0x140   :  { %849 = vmatpush3.bf16.msra.mxu1 %v902_v42 }
 0x141   :  { %850 = vmatprep.subr.bf16.mxu1 %v903_v43 }
 0x144   :  { %851 = vmatpush3.bf16.msra.mxu1 %v903_v43 }
 0x145   :  { %852 = vmatprep.subr.bf16.mxu1 %v904_v44 }
 0x148   :  { %853 = vmatpush3.bf16.msra.mxu1 %v904_v44 }
 0x149   :  { %854 = vmatprep.subr.bf16.mxu1 %v905_v45 }
 0x14c   :  { %855 = vmatpush3.bf16.msra.mxu1 %v905_v45 }
 0x14d   :  { %856 = vmatprep.subr.bf16.mxu1 %v906_v46 }
 0x150   :  { %857 = vmatpush3.bf16.msra.mxu1 %v906_v46 }
 0x151   :  { %858 = vmatprep.subr.bf16.mxu1 %v907_v53 }
 0x154   :  { %859 = vmatpush3.bf16.msra.mxu1 %v907_v53 }
 0x155   :  { %860 = vmatprep.subr.bf16.mxu1 %v908_v54 }
 0x158   :  { %861 = vmatpush3.bf16.msra.mxu1 %v908_v54 }
 0x20e   :  { %v816_v19 = vpop.f32.mrb[0].mxu1 }
 0x20f   :  { %v300_v20 = vadd.f32 %v816_v19, %v717_v18  ;;  %v291_v21 = vpop.f32.mrb[1].mxu1 }
 0x210   :  { %v292_v22 = vadd.f32 %v717_v18, %v291_v21  ;;  %v817_v23 = vpop.f32.mrb[2].mxu1 }
 0x211   :  { %v303_v24 = vadd.f32 %v817_v23, %v717_v18  ;;  %v294_v25 = vpop.f32.mrb[3].mxu1  ;;  %v308_v27 = vmax.f32 %v300_v20, 0.0 }
 0x212   :  { %v295_v26 = vadd.f32 %v717_v18, %v294_v25  ;;  %v306_v29 = vmax.f32 %v292_v22, 0.0 }
 0x213   :  { %v309_v28 = vmax.f32 %v303_v24, 0.0 }
 0x214   :  { %v307_v30 = vmax.f32 %v295_v26, 0.0 }
 0x215   :  { %v311_v31 = vpack.c.bf16 %v309_v28, %v308_v27 }
 0x216   :  { %v310_v32 = vpack.c.bf16 %v307_v30, %v306_v29 }
 0x218   :  { %818 = vmatprep.subr.bf16.mxu0 %v310_v32 }
 0x219   :  { %819 = vmatpush3.bf16.msra.mxu0 %v310_v32 }
 0x21a   :  { %820 = vmatprep.subr.bf16.mxu0 %v311_v31 }
 0x21d   :  { %821 = vmatpush3.bf16.msra.mxu0 %v311_v31 }
 0x21e   :  { %826 = vmatprep.subr.bf16.mxu0 %v893_v33 }
 0x220   :  { %823 = vmatmul.mubr.msk.bf16.vlgmr.msra.gmra.mrb[4].mxu0 %vm145_vm0, %v1186_v5 }
 0x221   :  { %827 = vmatpush3.bf16.msra.mxu0 %v893_v33 }
 0x222   :  { %828 = vmatprep.subr.bf16.mxu0 %v894_v34 }
 0x225   :  { %829 = vmatpush3.bf16.msra.mxu0 %v894_v34 }
 0x226   :  { %830 = vmatprep.subr.bf16.mxu0 %v895_v35 }
 0x229   :  { %831 = vmatpush3.bf16.msra.mxu0 %v895_v35 }
 0x22a   :  { %832 = vmatprep.subr.bf16.mxu0 %v896_v36 }
 0x22d   :  { %833 = vmatpush3.bf16.msra.mxu0 %v896_v36 }
 0x22e   :  { %834 = vmatprep.subr.bf16.mxu0 %v897_v37 }
 0x231   :  { %835 = vmatpush3.bf16.msra.mxu0 %v897_v37 }
 0x232   :  { %836 = vmatprep.subr.bf16.mxu0 %v898_v38 }
 0x235   :  { %837 = vmatpush3.bf16.msra.mxu0 %v898_v38 }
 0x236   :  { %838 = vmatprep.subr.bf16.mxu0 %v899_v39 }
 0x239   :  { %839 = vmatpush3.bf16.msra.mxu0 %v899_v39 }
 0x23a   :  { %840 = vmatprep.subr.bf16.mxu0 %v900_v40 }
 0x23d   :  { %841 = vmatpush3.bf16.msra.mxu0 %v900_v40 }
 0x2f3   :  { %v824_v47 = vpop.f32.mrb[4].mxu0 }
 0x2f4   :  { %v363_v48 = vpop.f32.mrb[5].mxu0 }
 0x2f5   :  { %v825_v49 = vpop.f32.mrb[6].mxu0 }
 0x2f6   :  { %v379_v50 = vpack.c.bf16 %v825_v49, %v824_v47  ;;  %v366_v51 = vpop.f32.mrb[7].mxu0 }
 0x2f7   :  { %v378_v52 = vpack.c.bf16 %v366_v51, %v363_v48 }
 0x2f9   :  { %842 = vmatprep.mubr.bf16.mxu0 %v378_v52 }
 0x2fa   :  { %843 = vmatmul.mubr.bf16.vlgmr.msra.gmra.mrb[8].mxu0 %v379_v50 }
 0x2fb   :  { %870 = vmatprep.mubr.msk.bf16.mxu0 %vm145_vm0, %v1182_v2 }
 0x3cd   :  { %v844_v56 = vpop.f32.mrb[8].mxu0 }
 0x3ce   :  { %v477_v57 = vadd.f32 %v844_v56, %v728_v55  ;;  %v468_v58 = vpop.f32.mrb[9].mxu0 }
 0x3cf   :  { %v469_v59 = vadd.f32 %v728_v55, %v468_v58  ;;  %v845_v60 = vpop.f32.mrb[10].mxu0 }
 0x3d0   :  { %v480_v61 = vadd.f32 %v845_v60, %v728_v55  ;;  %v471_v62 = vpop.f32.mrb[11].mxu0  ;;  %v485_v0 = vmax.f32 %v477_v57, 0.0 }
 0x3d1   :  { %v472_v63 = vadd.f32 %v728_v55, %v471_v62  ;;  %v483_v2 = vmax.f32 %v469_v59, 0.0 }
 0x3d2   :  { %v486_v1 = vmax.f32 %v480_v61, 0.0 }
 0x3d3   :  { %v484_v3 = vmax.f32 %v472_v63, 0.0 }
 0x3d4   :  { %v488_v4 = vpack.c.bf16 %v486_v1, %v485_v0 }
 0x3d5   :  { %v487_v6 = vpack.c.bf16 %v484_v3, %v483_v2 }
 0x3d7   :  { %862 = vmatprep.mubr.bf16.mxu1 %v487_v6 }
 0x3d8   :  { %863 = vmatmul.mubr.bf16.vlgmr.msra.gmra.mrb[4].mxu1 %v488_v4 }
 0x4ab   :  { %v864_v7 = vpop.f32.mrb[4].mxu1 }
 0x4ac   :  { %v588_v8 = vpop.f32.mrb[5].mxu1 }
 0x4ad   :  { %v865_v9 = vpop.f32.mrb[6].mxu1 }
 0x4ae   :  { %v604_v10 = vpack.c.bf16 %v865_v9, %v864_v7  ;;  %v591_v11 = vpop.f32.mrb[7].mxu1 }
 0x4af   :  { %v603_v12 = vpack.c.bf16 %v591_v11, %v588_v8 }
 0x4b1   :  { %866 = vmatprep.subr.bf16.mxu0 %v603_v12 }
 0x4b2   :  { %867 = vmatpush3.bf16.msra.mxu0 %v603_v12 }
 0x4b3   :  { %868 = vmatprep.subr.bf16.mxu0 %v604_v10 }
 0x4b6   :  { %869 = vmatpush3.bf16.msra.mxu0 %v604_v10 }
 0x4b9   :  { %871 = vmatmul.mubr.msk.bf16.vlgmr.msra.gmra.mrb[12].mxu0 %vm145_vm0, %v1186_v5 }
 0x58c   :  { %v872_v14 = vpop.f32.mrb[12].mxu0 }
 0x58d   :  { %v654_v15 = vadd.f32 %v872_v14, %v745_v13  ;;  %v645_v16 = vpop.f32.mrb[13].mxu0 }
 0x58e   :  { %v646_v17 = vadd.f32 %v745_v13, %v645_v16  ;;  %v873_v18 = vpop.f32.mrb[14].mxu0 }
 0x58f   :  { %664 = vmax.xlane.f32.xlu1 %v654_v15  ;;  %v648_v19 = vpop.f32.mrb[15].mxu0  ;;  %v657_v20 = vadd.f32 %v873_v18, %v745_v13 }
 0x590   :  { %660 = vmax.xlane.f32.xlu0 %v646_v17  ;;  %v649_v21 = vadd.f32 %v745_v13, %v648_v19 }
 0x593   :  { %666 = vmax.xlane.f32.xlu1 %v657_v20 }
 0x594   :  { %662 = vmax.xlane.f32.xlu0 %v649_v21 }
 0x61c   :  { %v665_v22 = vpop.xlane.xlu1 %664 }
 0x61d   :  { %v670_v23 = vsub.f32 %v654_v15, %v665_v22  ;;  %v661_v24 = vpop.xlane.xlu0 %660 }
 0x61e   :  { %v668_v5 = vsub.f32 %v646_v17, %v661_v24 }
 0x61f   :  { %v676_v27 = vmul.f32 1.442695, %v670_v23 }
 0x620   :  { %v672_v25 = vmul.f32 1.442695, %v668_v5  ;;  %v667_v26 = vpop.xlane.xlu1 %666 }
 0x621   :  { %v663_v28 = vpop.xlane.xlu0 %662  ;;  %v671_v29 = vsub.f32 %v657_v20, %v667_v26 }
 0x622   :  { %909 = vpow2.f32 %v672_v25  ;;  %v669_v30 = vsub.f32 %v649_v21, %v663_v28 }
 0x623   :  { %911 = vpow2.f32 %v676_v27  ;;  %v678_v32 = vmul.f32 1.442695, %v671_v29 }
 0x624   :  { %v674_v31 = vmul.f32 1.442695, %v669_v30 }
 0x626   :  { %913 = vpow2.f32 %v674_v31 }
 0x627   :  { %915 = vpow2.f32 %v678_v32 }
 0x62c   :  { %v910_v33 = vpop.eup %909 }
 0x62d   :  { %680 = vadd.xlane.f32.xlu0 %v910_v33  ;;  %v912_v34 = vpop.eup %911 }
 0x630   :  { %v914_v35 = vpop.eup %913 }
 0x631   :  { %684 = vadd.xlane.f32.xlu0 %v912_v34  ;;  %682 = vadd.xlane.f32.xlu1 %v914_v35  ;;  %v916_v36 = vpop.eup %915 }
 0x635   :  { %686 = vadd.xlane.f32.xlu1 %v916_v36 }
 0x6ba   :  { %v681_v37 = vpop.xlane.xlu0 %680 }
 0x6bb   :  { %917 = vlog2.f32 %v681_v37 }
 0x6be   :  { %v683_v38 = vpop.xlane.xlu1 %682  ;;  %v685_v39 = vpop.xlane.xlu0 %684 }
 0x6bf   :  { %919 = vlog2.f32 %v683_v38 }
 0x6c0   :  { %921 = vlog2.f32 %v685_v39 }
 0x6c2   :  { %v687_v40 = vpop.xlane.xlu1 %686 }
 0x6c3   :  { %923 = vlog2.f32 %v687_v40 }
 0x6c5   :  { %v918_v41 = vpop.eup %917 }
 0x6c6   :  { %v689_v42 = vmul.f32 0.6931472, %v918_v41 }
 0x6c8   :  { %v696_v43 = vsub.f32 %v668_v5, %v689_v42 }
 0x6c9   :  { %v920_v44 = vpop.eup %919 }
 0x6ca   :  { %v922_v45 = vpop.eup %921  ;;  %700 = vst [vmem:[%s1227_s8] sm:$0xff] %v696_v43  ;;  %v691_v46 = vmul.f32 0.6931472, %v920_v44 }
 0x6cb   :  { %v693_v47 = vmul.f32 0.6931472, %v922_v45 }
 0x6cc   :  { %v697_v48 = vsub.f32 %v669_v30, %v691_v46 }
 0x6cd   :  { %v924_v49 = vpop.eup %923  ;;  %v698_v50 = vsub.f32 %v670_v23, %v693_v47 }
 0x6ce   :  { %701 = vst [vmem:[%s1227_s8 + $0x8] sm:$0xff] %v697_v48  ;;  %v695_v51 = vmul.f32 0.6931472, %v924_v49 }
 0x6cf   :  { %702 = vst [vmem:[%s1227_s8 + $0x10] sm:$0xff] %v698_v50 }
 0x6d0   :  { %v699_v52 = vsub.f32 %v671_v29, %v695_v51 }
 0x6d2   :  { %703 = vst [vmem:[%s1227_s8 + $0x18] sm:$0xff] %v699_v52 }
 0x6d3   :  { %708 = vsyncpa [#allocation3], 1 }
 0x6d4   :  { %709 = vsyncpa [#allocation5], 1 }
 0x6d5   :  { %710 = vsyncpa [#allocation8], 1 }

</bundles_post_ra>
